<compile_context>
chip_gen: v7x
topology: tpu7x:2x2x1
jax: 0.10.0
libtpu: 0.0.40
codegen_flags: <defaults>
</compile_context>

<pallas_src>
from functools import partial

import jax
import jax.numpy as jnp
from jax.experimental import pallas as pl
from jax.experimental.pallas import tpu as pltpu


def _eca_kernel(bias_ref, w_ref, x_ref, o_ref, *, k, pad):
    # bias_ref : SMEM (1,)        conv bias
    # w_ref    : SMEM (k,)        conv taps
    # x_ref    : VMEM (NB, C, T)  input batch-block (T lane-dense)
    # o_ref    : VMEM (NB, C, T)
    x = x_ref[...]                                                    # native dtype
    _, C, T = x.shape

    # Global average pool over T (lanes); accumulate in f32 without an f32 slab copy.
    m = jnp.sum(x, axis=-1, keepdims=True, dtype=jnp.float32) * (1.0 / T)   # (NB, C, 1)

    # k-tap "same" conv across channels: y[c] = sum_t w[t] * m[c + t - pad].
    # Each tap is a sublane roll (XLU) + masked FMA (VPU); wrap rows are zeroed
    # to match conv1d zero padding.
    c_idx = jax.lax.broadcasted_iota(jnp.int32, m.shape, 1)                 # channel index
    y = jnp.zeros_like(m)
    for t in range(k):                                # k is tiny & static -> unrolled
        d = t - pad                                   # channel offset of this tap
        mt = m if d == 0 else pltpu.roll(m, shift=(-d) % C, axis=1)         # mt[c] = m[c+d]
        mt = jnp.where((c_idx + d >= 0) & (c_idx + d < C), mt, 0.0)         # zero padding
        y = y + w_ref[t] * mt

    s = jax.nn.sigmoid(y + bias_ref[0])               # (NB, C, 1) f32 gate
    o_ref[...] = (x * s.astype(x.dtype)).astype(o_ref.dtype)   # broadcast over lanes (T)


def eca_attention(x, conv_weight, conv_bias=None, *, batch_block=None):
    """x: (N, C, T); conv_weight: (1, 1, k); conv_bias: (1,) or None."""
    N, C, T = x.shape
    w = conv_weight.reshape(-1).astype(jnp.float32)
    k = int(w.shape[0])
    # Even kernel_size with padding=(k-1)//2 changes the PyTorch output length;
    # only the odd (ECA default) case is a "same" conv.
    assert k % 2 == 1, "ECAAttention Pallas kernel requires odd kernel_size"
    pad = (k - 1) // 2
    assert pad < C, "kernel_size must be smaller than 2*C"
    bias = (jnp.zeros((1,), jnp.float32) if conv_bias is None
            else conv_bias.reshape(1).astype(jnp.float32))

    itemsize = jnp.dtype(x.dtype).itemsize
    slab_bytes = C * T * itemsize

    # ---- batch block size: biggest roofline-sized block that fits the budget ----
    if batch_block is None:
        TARGET_BLOCK_BYTES = 6 << 20                  # per-buffer DMA block target
        nb = max(1, min(N, TARGET_BLOCK_BYTES // max(slab_bytes, 1)))
        if N > 1:                                     # keep >=2 grid steps so both v7x TCs get work
            nb = min(nb, pl.cdiv(N, 2))
    else:
        nb = max(1, min(N, int(batch_block)))
    grid = (pl.cdiv(N, nb),)

    # ---- explicit VMEM budget: 2x(in block) + 2x(out block) + headroom ----------
    block_bytes = nb * slab_bytes
    vmem_needed = 4 * block_bytes + (1 << 20)
    vmem_limit = int(min(max(int(vmem_needed * 1.25), 4 << 20), 64 << 20))
    # TODO(synk): if a single (1, C, T) slab exceeds the v7x (64 MiB) budget, switch to
    # a two-pass layout: tiny pool+conv+sigmoid pass producing the (N, C) gate, then a
    # T-tiled rescale pass.

    cost = pl.CostEstimate(
        flops=2 * N * C * T + 2 * N * C * k,
        transcendentals=N * C,
        bytes_accessed=2 * N * C * T * itemsize + (k + 1) * 4,
    )

    return pl.pallas_call(
        partial(_eca_kernel, k=k, pad=pad),
        out_shape=jax.ShapeDtypeStruct((N, C, T), x.dtype),
        grid=grid,
        in_specs=[
            pl.BlockSpec(memory_space=pltpu.SMEM),             # conv bias (1,)
            pl.BlockSpec(memory_space=pltpu.SMEM),             # conv weights (k,)
            pl.BlockSpec((nb, C, T), lambda n: (n, 0, 0)),     # x batch-block
        ],
        out_specs=pl.BlockSpec((nb, C, T), lambda n: (n, 0, 0)),
        compiler_params=pltpu.CompilerParams(
            dimension_semantics=("parallel",),
            vmem_limit_bytes=vmem_limit),
        cost_estimate=cost,
    )(bias, w, x)


def _eca_reference(x, conv_weight, conv_bias):
    """Pure-JAX reference matching PyTorch ECAAttention.forward."""
    N, C, T = x.shape
    w = conv_weight.reshape(-1)
    k = w.shape[0]
    pad = (k - 1) // 2
    m = jnp.mean(x, axis=-1)                                  # (N, C)
    m_pad = jnp.pad(m, ((0, 0), (pad, pad)))
    y = sum(w[t] * m_pad[:, t:t + C] for t in range(k))
    if conv_bias is not None:
        y = y + conv_bias[0]
    s = jax.nn.sigmoid(y)
    return x * s[:, :, None]


if __name__ == "__main__":
    key = jax.random.PRNGKey(0)
    k1, k2, k3 = jax.random.split(key, 3)

    N, C, T = 8, 16, 128          # NCT; lane (T=128) and sublane (C=16) friendly
    kernel_size = 3               # ECAAttention default

    x = jax.random.normal(k1, (N, C, T), dtype=jnp.float32)
    conv_weight = jax.random.normal(k2, (1, 1, kernel_size), dtype=jnp.float32) * 0.5
    conv_bias = jax.random.normal(k3, (1,), dtype=jnp.float32) * 0.1

    out = eca_attention(x, conv_weight, conv_bias)
    out = jax.block_until_ready(out)

    ref = _eca_reference(x, conv_weight, conv_bias)
    assert out.shape == (N, C, T)
    assert jnp.allclose(out, ref, rtol=1e-5, atol=1e-5), float(jnp.max(jnp.abs(out - ref)))

    print("KERNEL_OK")
</pallas_src>

<mosaic_0001>
module attributes {stable_mosaic.version = 11 : i64} {
  func.func @_eca_kernel(%arg0: i32, %arg1: memref<1xf32, #tpu.memory_space<smem>>, %arg2: memref<3xf32, #tpu.memory_space<smem>>, %arg3: memref<4x16x128xf32, #tpu.memory_space<vmem>>, %arg4: memref<4x16x128xf32, #tpu.memory_space<vmem>>) attributes {dimension_semantics = [#tpu.dimension_semantics<parallel>], iteration_bounds = array<i64: 2>, scalar_prefetch = 0 : i64, scratch_operands = 0 : i64, tpu.core_type = #tpu.core_type<tc>, window_params = [{transform_indices = @transform_0, window_bounds = array<i64: 1>}, {transform_indices = @transform_1, window_bounds = array<i64: 3>}, {transform_indices = @transform_2, window_bounds = array<i64: 4, 16, 128>}, {transform_indices = @transform_3, window_bounds = array<i64: 4, 16, 128>}]} {
    %c0 = arith.constant 0 : index
    %c0_0 = arith.constant 0 : index
    %c0_1 = arith.constant 0 : index
    %0 = vector.load %arg3[%c0, %c0_0, %c0_1] : memref<4x16x128xf32, #tpu.memory_space<vmem>>, vector<4x16x128xf32>
    %cst = arith.constant dense<0.000000e+00> : vector<4x16xf32>
    %1 = vector.multi_reduction <add>, %0, %cst [2] : vector<4x16x128xf32> to vector<4x16xf32>
    %2 = vector.shape_cast %1 : vector<4x16xf32> to vector<4x16x1xf32>
    %cst_2 = arith.constant 7.812500e-03 : f32
    %3 = vector.broadcast %cst_2 : f32 to vector<4x16x1xf32>
    %4 = arith.mulf %2, %3 : vector<4x16x1xf32>
    %5 = tpu.iota {dimensions = array<i32: 1>} : vector<4x16x1xi32>
    %cst_3 = arith.constant 0.000000e+00 : f32
    %6 = vector.broadcast %cst_3 : f32 to vector<4x16x1xf32>
    %c1_i32 = arith.constant 1 : i32
    %7 = tpu.dynamic_rotate %4 by %c1_i32 dim 1 : vector<4x16x1xf32>, i32 -> vector<4x16x1xf32>
    %c-1_i32 = arith.constant -1 : i32
    %8 = vector.broadcast %c-1_i32 : i32 to vector<4x16x1xi32>
    %9 = arith.addi %5, %8 : vector<4x16x1xi32>
    %c0_i32 = arith.constant 0 : i32
    %10 = vector.broadcast %c0_i32 : i32 to vector<4x16x1xi32>
    %11 = arith.cmpi sge, %9, %10 : vector<4x16x1xi32>
    %c-1_i32_4 = arith.constant -1 : i32
    %12 = vector.broadcast %c-1_i32_4 : i32 to vector<4x16x1xi32>
    %13 = arith.addi %5, %12 : vector<4x16x1xi32>
    %c16_i32 = arith.constant 16 : i32
    %14 = vector.broadcast %c16_i32 : i32 to vector<4x16x1xi32>
    %15 = arith.cmpi slt, %13, %14 : vector<4x16x1xi32>
    %16 = arith.andi %11, %15 : vector<4x16x1xi1>
    %cst_5 = arith.constant 0.000000e+00 : f32
    %17 = vector.broadcast %cst_5 : f32 to vector<4x16x1xf32>
    %18 = arith.select %16, %7, %17 : vector<4x16x1xi1>, vector<4x16x1xf32>
    %c0_6 = arith.constant 0 : index
    %19 = memref.load %arg2[%c0_6] : memref<3xf32, #tpu.memory_space<smem>>
    %20 = vector.broadcast %19 : f32 to vector<4x16x1xf32>
    %21 = arith.mulf %20, %18 : vector<4x16x1xf32>
    %22 = arith.addf %6, %21 : vector<4x16x1xf32>
    %c0_i32_7 = arith.constant 0 : i32
    %23 = vector.broadcast %c0_i32_7 : i32 to vector<4x16x1xi32>
    %24 = arith.addi %5, %23 : vector<4x16x1xi32>
    %c0_i32_8 = arith.constant 0 : i32
    %25 = vector.broadcast %c0_i32_8 : i32 to vector<4x16x1xi32>
    %26 = arith.cmpi sge, %24, %25 : vector<4x16x1xi32>
    %c0_i32_9 = arith.constant 0 : i32
    %27 = vector.broadcast %c0_i32_9 : i32 to vector<4x16x1xi32>
    %28 = arith.addi %5, %27 : vector<4x16x1xi32>
    %c16_i32_10 = arith.constant 16 : i32
    %29 = vector.broadcast %c16_i32_10 : i32 to vector<4x16x1xi32>
    %30 = arith.cmpi slt, %28, %29 : vector<4x16x1xi32>
    %31 = arith.andi %26, %30 : vector<4x16x1xi1>
    %cst_11 = arith.constant 0.000000e+00 : f32
    %32 = vector.broadcast %cst_11 : f32 to vector<4x16x1xf32>
    %33 = arith.select %31, %4, %32 : vector<4x16x1xi1>, vector<4x16x1xf32>
    %c1 = arith.constant 1 : index
    %34 = memref.load %arg2[%c1] : memref<3xf32, #tpu.memory_space<smem>>
    %35 = vector.broadcast %34 : f32 to vector<4x16x1xf32>
    %36 = arith.mulf %35, %33 : vector<4x16x1xf32>
    %37 = arith.addf %22, %36 : vector<4x16x1xf32>
    %c15_i32 = arith.constant 15 : i32
    %38 = tpu.dynamic_rotate %4 by %c15_i32 dim 1 : vector<4x16x1xf32>, i32 -> vector<4x16x1xf32>
    %c1_i32_12 = arith.constant 1 : i32
    %39 = vector.broadcast %c1_i32_12 : i32 to vector<4x16x1xi32>
    %40 = arith.addi %5, %39 : vector<4x16x1xi32>
    %c0_i32_13 = arith.constant 0 : i32
    %41 = vector.broadcast %c0_i32_13 : i32 to vector<4x16x1xi32>
    %42 = arith.cmpi sge, %40, %41 : vector<4x16x1xi32>
    %c1_i32_14 = arith.constant 1 : i32
    %43 = vector.broadcast %c1_i32_14 : i32 to vector<4x16x1xi32>
    %44 = arith.addi %5, %43 : vector<4x16x1xi32>
    %c16_i32_15 = arith.constant 16 : i32
    %45 = vector.broadcast %c16_i32_15 : i32 to vector<4x16x1xi32>
    %46 = arith.cmpi slt, %44, %45 : vector<4x16x1xi32>
    %47 = arith.andi %42, %46 : vector<4x16x1xi1>
    %cst_16 = arith.constant 0.000000e+00 : f32
    %48 = vector.broadcast %cst_16 : f32 to vector<4x16x1xf32>
    %49 = arith.select %47, %38, %48 : vector<4x16x1xi1>, vector<4x16x1xf32>
    %c2 = arith.constant 2 : index
    %50 = memref.load %arg2[%c2] : memref<3xf32, #tpu.memory_space<smem>>
    %51 = vector.broadcast %50 : f32 to vector<4x16x1xf32>
    %52 = arith.mulf %51, %49 : vector<4x16x1xf32>
    %53 = arith.addf %37, %52 : vector<4x16x1xf32>
    %c0_17 = arith.constant 0 : index
    %54 = memref.load %arg1[%c0_17] : memref<1xf32, #tpu.memory_space<smem>>
    %55 = vector.broadcast %54 : f32 to vector<4x16x1xf32>
    %56 = arith.addf %53, %55 : vector<4x16x1xf32>
    %57 = arith.negf %56 : vector<4x16x1xf32>
    %58 = math.exp %57 : vector<4x16x1xf32>
    %cst_18 = arith.constant 1.000000e+00 : f32
    %59 = vector.broadcast %cst_18 : f32 to vector<4x16x1xf32>
    %60 = arith.addf %59, %58 : vector<4x16x1xf32>
    %61 = arith.divf %59, %60 : vector<4x16x1xf32>
    %62 = vector.broadcast %61 : vector<4x16x1xf32> to vector<4x16x128xf32>
    %63 = arith.mulf %0, %62 : vector<4x16x128xf32>
    %c0_19 = arith.constant 0 : index
    %c0_20 = arith.constant 0 : index
    %c0_21 = arith.constant 0 : index
    %64 = vector.load %arg4[%c0_19, %c0_20, %c0_21] : memref<4x16x128xf32, #tpu.memory_space<vmem>>, vector<4x16x128xf32>
    tpu.vector_store %arg4[%c0_19, %c0_20, %c0_21], %63 {strides = array<i32>} : memref<4x16x128xf32, #tpu.memory_space<vmem>>, vector<4x16x128xf32>,
    return
  }
  func.func @transform_0(%arg0: i32) -> i32 {
    %c0_i32 = arith.constant 0 : i32
    %c0_i32_0 = arith.constant 0 : i32
    return %c0_i32 : i32
  }
  func.func @transform_1(%arg0: i32) -> i32 {
    %c0_i32 = arith.constant 0 : i32
    %c0_i32_0 = arith.constant 0 : i32
    return %c0_i32 : i32
  }
  func.func @transform_2(%arg0: i32) -> (i32, i32, i32) {
    %c0_i32 = arith.constant 0 : i32
    %c0_i32_0 = arith.constant 0 : i32
    %c0_i32_1 = arith.constant 0 : i32
    return %arg0, %c0_i32, %c0_i32_0 : i32, i32, i32
  }
  func.func @transform_3(%arg0: i32) -> (i32, i32, i32) {
    %c0_i32 = arith.constant 0 : i32
    %c0_i32_0 = arith.constant 0 : i32
    %c0_i32_1 = arith.constant 0 : i32
    return %arg0, %c0_i32, %c0_i32_0 : i32, i32, i32
  }
}

</mosaic_0001>

<bundles_post_ra>
// kernel: tpu_custom_call.1
= control target key start
LH: loop header
LB: loop body
LE: loop exit
PB: predicated region body
PF: predicated region fallthrough
CT: control target
= control target key end

     0   :  { %s1191_s0 = inlined_call_operand.<no memory space> [shape: f32[1], index: 0, kind: input, shape index: {}]   ;;  %s1192_s1 = inlined_call_operand.vmem [shape: f32[3], index: 1, kind: input, shape index: {}]   ;;  %s1193_s2 = inlined_call_operand.hbm [shape: f32[8,16,128], index: 2, kind: input, shape index: {}]   ;;  %s1194_s3 = inlined_call_operand.hbm [shape: f32[8,16,128], index: 3, kind: output, shape index: {}]  }
   0x1   :  { %8 = sst [smem:[#allocation2]] %s1191_s0 }
   0x2   :  { %9 = vsyncpa [#allocation6], 0 }
   0x3   :  { %10 = vsyncpa [#allocation4], 0 }
   0x4   :  { %12 = vsyncpa [#allocation4 + $0x1], 0 }
   0x5   :  { %13 = vsyncpa [#allocation5], 0 }
   0x6   :  { %15 = vsyncpa [#allocation5 + $0x1], 0  ;;  %s866_s14 = smov 0   ;;  %s868_s15 = smov 0  }
   0x7   :  { %s870_s16 = smov 0   ;;  %s872_s17 = smov 0  }
   0x8 LB: > { %s887_s0 = sadd.s32 4294967295, %s833_s17   ;;  %s590_s18 = sadd.s32 4294967294, %s833_s17   ;;  %s833_s17 = sphi %s872_s17, %s1214_s17   ;;  %s829_s16 = sphi %s870_s16, %s1213_s16   ;;  %s825_s15 = sphi %s868_s15, %s1212_s15   ;;  %s821_s14 = sphi %s866_s14, %s1211_s14  }
   0x9   : > { %s891_s19 = sadd.s32 1, %s833_s17   ;;  %s70_s20 = sadd.s32 1, %s829_s16 }
   0xa   : > { %s67_s21 = ssub.s32 %s833_s17, %s891_s19  ;;  %p77_p0 = scmp.ne.s32.totalorder %s829_s16, %s825_s15 }
   0xb   : > { %p68_p1 = scmp.eq.s32.totalorder %s67_s21, 0  ;;  %p78_p2 = scmp.eq.s32.totalorder %s833_s17, 0 }
   0xc   : > { %p83_p3 = scmp.ne.s32.totalorder %s825_s15, %s821_s14  ;;  %p1196_p4 = scmp.eq.s32.totalorder %s887_s0, 0 }
   0xd   : > { %s903_s22 = scalar_select %p68_p1, %s829_s16, %s70_s20  }
   0xe   : > { %p905_p5 = por %p78_p2, %p77_p0  ;;  %p911_p6 = por %p1196_p4, %p83_p3 }
   0xf   : > { %p107_p7 = scmp.eq.s32.totalorder %s887_s0, 1  ;;  %p113_p8 = scmp.eq.s32.totalorder %s590_s18, 1 }
  0x10   : > { %s1199_s24 = scalar_select %p911_p6, 1, 0 }
  0x11   : > { %p591_p9 = scmp.ge.s32.totalorder %s833_s17, 1  ;;  %p120_p10 = scmp.lt.s32.totalorder %s833_s17, 3 }
  0x12   : > { %p918_p11 = por %p107_p7, %p77_p0  ;;  %p922_p12 = por %p113_p8, %p83_p3 }
  0x13   : > { %p926_p13 = pnand %p591_p9, %p120_p10  ;;  %s136_s30 = sshll.u32 %s1192_s1, 4  ;;  %s137_s30 = int_to_ptr.vmem [resolvable:$true] %s136_s30 }
  0x14   : > { %s1200_s25 = scalar_select %p918_p11, 1, 0 }
  0x15   : > { %s1201_s26 = scalar_select %p922_p12, 1, 0 }
  0x16   : > { %p630_p1 = pneg %p926_p13  ;;  %p643_p2 = scmp.lt.s32.totalorder %s833_s17, 2 }
  0x17   : > { %s147_s5 = sand.u32 1, %s829_s16   ;;  %s718_s8 = scalar_lea.vmem %s137_s30, 16 }
  0x18   : > { %p939_p7 = pnand %p630_p1, %p1196_p4  ;;  %p946_p3 = pnand %p643_p2, %p905_p5 }
  0x19   : > { %s594_s7 = sshll.u32 %s147_s5, 6  ;;  %p719_p8 = scmp.ne.s32.totalorder %s137_s30, %s718_s8 }
  0x1a   : > { %p720_p9 = pneg %p939_p7  ;;  %p726_p12 = scmp.lt.s32.totalorder %s137_s30, %s137_s30 }
  0x1b   : > { %p727_p11 = scmp.lt.s32.totalorder %s718_s8, %s718_s8 }
  0x1c   : > { %p721_p10 = pnand %p720_p9, %p719_p8 }
  0x1d   : > { %p728_p1 = por %p727_p11, %p726_p12 }
  0x1e   : > { %p722_p0 = pneg %p721_p10 }
  0x20   : > { %p729_p4 = pnand %p728_p1, %p722_p0 }
  0x22   : > { %732 = shalt.err (!%p729_p4)
}
  0x23   : > { %s835_s9 = smov [#allocation3]   ;;  %s619_s10 = sshll.u32 %s833_s17, 10 }
  0x24   : > { %633 = dma.vmem_to_smem (!%p939_p7), %s137_s30, 16, %s835_s9, [#allocation6]  }
  0x25   : > { %s151_s11 = scalar_lea.vmem [#allocation7], %s594_s7  ;;  %s958_s20 = scalar_lea.hbm %s1193_s2, %s619_s10 }
  0x26   : > { %s159_s12 = sshll.u32 %s151_s11, 4  ;;  %s962_s21 = scalar_lea.sflag [#allocation4], %s147_s5  ;;  %s960_s12 = int_to_ptr.vmem [resolvable:$true] %s159_s12 }
  0x27   : > { %s733_s23 = scalar_lea.hbm %s958_s20, 1024  ;;  %p735_p5 = pneg %p946_p3 }
  0x28   : > { %p734_p4 = scmp.ne.s32.totalorder %s958_s20, %s733_s23  ;;  %s738_s30 = scalar_lea.hbm %s1193_s2, 2048 }
  0x29   : > { %p739_p0 = scmp.lt.u32.totalorder %s958_s20, %s1193_s2  ;;  %p740_p2 = scmp.lt.u32.totalorder %s738_s30, %s733_s23 }
  0x2a   : > { %p736_p11 = pnand %p735_p5, %p734_p4  ;;  %p742_p8 = scmp.lt.u32.totalorder %s733_s23, %s958_s20 }
  0x2b   : > { %p741_p7 = por %p740_p2, %p739_p0 }
  0x2c   : > { %p737_p12 = pneg %p736_p11 }
  0x2d   : > { %p743_p9 = por %p742_p8, %p741_p7 }
  0x2f   : > { %p744_p10 = pnand %p743_p9, %p737_p12 }
  0x31   : > { %747 = shalt.err (!%p744_p10)
}
  0x32   : > { %s748_s5 = scalar_lea.vmem %s960_s12, 1024  ;;  %s836_s8 = smov [#allocation7]  }
  0x33   : > { %p749_p1 = scmp.ne.s32.totalorder %s960_s12, %s748_s5  ;;  %s753_s9 = sshll.u32 %s836_s8, 4  ;;  %s754_s9 = int_to_ptr.vmem [resolvable:$false] %s753_s9 }
  0x34   : > { %s755_s10 = scalar_lea.vmem %s754_s9, 2048  ;;  %p756_p6 = scmp.lt.s32.totalorder %s960_s12, %s754_s9 }
  0x35   : > { %p751_p4 = pnand %p749_p1, %p735_p5  ;;  %p757_p0 = scmp.lt.s32.totalorder %s755_s10, %s748_s5 }
  0x37   : > { %p752_p11 = pneg %p751_p4  ;;  %p758_p2 = por %p757_p0, %p756_p6 }
  0x39   : > { %p759_p7 = pnand %p758_p2, %p752_p11 }
  0x3b   : > { %762 = shalt.err (!%p759_p7)
}
  0x3c   : > { %s837_s11 = smov 128   ;;  %s838_s13 = smov 8  }
  0x3d   : > { %637 = dma.hbm_to_vmem [thread:$0]  (!%p946_p3), %s958_s20, 1024, %s960_s12, %s962_s21, %s837_s11, %s837_s11, %s838_s13  }
  0x3e   : > { %171 = sbr.rel (%p926_p13) target bundleno = 434 (0x1b2), region = 32  ;;  %p1205_p5 = scmp.eq.s32.totalorder (!%p926_p13), %s887_s0, 0 }
  0x45   : > { %808 = dma.done.wait (%p1205_p5), [#allocation6], 16   ;;  %p1206_p12 = pmov %p1205_p5 }
  0x46   : > { %s997_s18 = sand.u32 1, %s825_s15   ;;  %p1207_p6 = scmp.ne.s32.totalorder %s1199_s24, 0 }
  0x47   : > { %810 = vsyncadd (%p1206_p12), [#allocation6], 4294967280  ;;  %s600_s23 = sshll.u32 %s997_s18, 6  ;;  %s178_s28 = scalar_lea.sflag [#allocation4], %s997_s18 }
  0x48   : > { %s181_s6 = scalar_lea.vmem [#allocation7], %s600_s23 }
  0x49   : > { %812 = dma.done.wait (%p1207_p6), %s178_s28, 1024  }
  0x4a   : > { %814 = vsyncadd (%p1207_p6), %s178_s28, 4294966272 }
  0x4b   : > { %186 = sfence }
  0x4c   : > { %v1007_v0 = vld [vmem:[%s181_s6 + $0x10] sm:$0xff]  ;;  %v1009_v1 = vld [vmem:[%s181_s6] sm:$0xff]  ;;  %v1013_v2 = vld [vmem:[%s181_s6 + $0x18] sm:$0xff]  ;;  %v839_v8 = vmov 0   ;;  %v239_v9 = vlaneseq  ;;  %s602_s24 = sld [smem:[#allocation3 + $0x1]]  ;;  %s275_s27 = sld [smem:[#allocation3]] }
  0x4d   : > { %219 = vadd.xlane.f32.xlu1 %v1007_v0  ;;  %215 = vadd.xlane.f32.xlu0 %v1009_v1  ;;  %v1015_v3 = vld [vmem:[%s181_s6 + $0x8] sm:$0xff]  ;;  %v1021_v5 = vld [vmem:[%s181_s6 + $0x20] sm:$0xff]  ;;  %v1025_v6 = vld [vmem:[%s181_s6 + $0x38] sm:$0xff]  ;;  %s603_s12 = sld [smem:[#allocation3 + $0x2]]  ;;  %s376_s20 = sld [smem:[#allocation2]] }
  0x4e   : > { %v1019_v4 = vld [vmem:[%s181_s6 + $0x28] sm:$0xff]  ;;  %v1027_v7 = vld [vmem:[%s181_s6 + $0x30] sm:$0xff]  ;;  %685 = vset.pattern.permute.xlu1 %v839_v8  ;;  %684 = vset.pattern.permute.xlu0 %v839_v8  ;;  %v1031_v10 = vshrl.u32 %v239_v9, 7  ;;  %s204_s21 = scalar_lea.vmem [#allocation8], %s600_s23  ;;  %s621_s29 = sshll.u32 %s887_s0, 10 }
  0x4f   : > { %s505_s30 = sshll.u32 %s204_s21, 4  ;;  %s1144_s5 = scalar_lea.hbm %s1194_s3, %s621_s29  ;;  %s1146_s30 = int_to_ptr.vmem [resolvable:$true] %s505_s30 }
  0x50   : > { %v241_v11 = vadd.s32 8, %v1031_v10  ;;  %v1035_v14 = vadd.s32 4294967295, %v1031_v10  ;;  %vm250_vm0 = vcmp.lt.s32.totalorder %v1031_v10, 1  ;;  %vm333_vm2 = vcmp.lt.s32.totalorder %v1031_v10, 7  ;;  %s491_s8 = scalar_lea.sflag [#allocation5], %s997_s18  ;;  %s763_s9 = scalar_lea.vmem %s1146_s30, 1024 }
  0x51   : > { %221 = vadd.xlane.f32.xlu1 %v1013_v2  ;;  %217 = vadd.xlane.f32.xlu0 %v1015_v3  ;;  %p764_p13 = scmp.ne.s32.totalorder %s1146_s30, %s763_s9  ;;  %p1208_p3 = scmp.ne.s32.totalorder %s1200_s25, 0 }
  0x52   : > { %v1037_v16 = vadd.s32 1, %v241_v11  ;;  %v1039_v17 = vstv %s602_s24  ;;  %vm261_vm1 = vcmp.ge.s32.totalorder %v1035_v14, 0  ;;  %v1044_v25 = vstv %s275_s27  ;;  %s840_s0 = smov [#allocation8]  }
  0x53   : > { %v1047_v26 = vstv %s603_s12  ;;  %v1049_v27 = vstv %s376_s20  ;;  %p765_p8 = pnand %p764_p13, %p1208_p3  ;;  %s767_s10 = sshll.u32 %s840_s0, 4  ;;  %s768_s10 = int_to_ptr.vmem [resolvable:$false] %s767_s10 }
  0x54   : > { %vm347_vm3 = vcmp.lt.s32.totalorder %v1037_v16, 16  ;;  %s769_s11 = scalar_lea.vmem %s768_s10, 2048  ;;  %p770_p10 = scmp.lt.s32.totalorder %s1146_s30, %s768_s10 }
  0x55   : > { %225 = vadd.xlane.f32.xlu1 %v1019_v4  ;;  %223 = vadd.xlane.f32.xlu0 %v1021_v5  ;;  %p766_p9 = pneg %p765_p8  ;;  %p771_p1 = scmp.lt.s32.totalorder %s769_s11, %s763_s9 }
  0x57   : > { %p772_p4 = por %p771_p1, %p770_p10 }
  0x59   : > { %229 = vadd.xlane.f32.xlu1 %v1025_v6  ;;  %227 = vadd.xlane.f32.xlu0 %v1027_v7  ;;  %p773_p11 = pnand %p772_p4, %p766_p9 }
  0xda   : > { %v220_v12 = vpop.xlane.xlu1 %219  ;;  %v216_v13 = vpop.xlane.xlu0 %215 }
  0xdb   : > { %v233_v15 = vmul.f32 0.0078125, %v220_v12  ;;  %v231_v18 = vmul.f32 0.0078125, %v216_v13 }
  0xdd   : > { %v243_v21 = vrot.slane %v233_v15, 7  ;;  %v326_v22 = vrot.slane %v233_v15, 1  ;;  %v311_v28 = vmul.f32 %v1039_v17, %v233_v15  ;;  %v242_v32 = vrot.slane %v231_v18, 7 }
  0xde   : > { %v222_v19 = vpop.xlane.xlu1 %221  ;;  %v218_v20 = vpop.xlane.xlu0 %217  ;;  %v309_v33 = vmul.f32 %v1039_v17, %v231_v18  ;;  %v325_v36 = vrot.slane %v231_v18, 1 }
  0xdf   : > { %v234_v23 = vmul.f32 0.0078125, %v222_v19  ;;  %v232_v24 = vmul.f32 0.0078125, %v218_v20 }
  0xe1   : > { %v247_v29 = vrot.slane %v234_v23, 7  ;;  %v330_v30 = vrot.slane %v234_v23, 1  ;;  %v246_v31 = vrot.slane %v232_v24, 7  ;;  %v312_v34 = vmul.f32 %v1039_v17, %v234_v23 }
  0xe2   : > { %v329_v35 = vrot.slane %v232_v24, 1  ;;  %v310_v43 = vmul.f32 %v1039_v17, %v232_v24  ;;  %v226_v48 = vpop.xlane.xlu1 %225  ;;  %v224_v53 = vpop.xlane.xlu0 %223 }
  0xe3   : > { %v252_v37 = vsel %vm250_vm0, %v243_v21, %v247_v29  ;;  %v256_v38 = vsel %vm250_vm0, %v247_v29, %v243_v21  ;;  %v339_v39 = vsel %vm333_vm2, %v330_v30, %v326_v22  ;;  %v251_v46 = vsel %vm250_vm0, %v242_v32, %v246_v31 }
  0xe4   : > { %v269_v40 = vsel %vm261_vm1, %v256_v38, 0.0  ;;  %v280_v41 = vmul.f32 %v1044_v25, %v252_v37  ;;  %v353_v42 = vsel %vm347_vm3, %v339_v39, 0.0  ;;  %v255_v47 = vsel %vm250_vm0, %v246_v31, %v242_v32 }
  0xe5   : > { %v279_v44 = vmul.f32 %v1044_v25, %v269_v40  ;;  %v363_v45 = vmul.f32 %v1047_v26, %v353_v42  ;;  %v267_v50 = vsel %vm261_vm1, %v255_v47, 0.0  ;;  %v278_v51 = vmul.f32 %v1044_v25, %v251_v46 }
  0xe6   : > { %v320_v49 = vadd.f32 %v312_v34, %v280_v41  ;;  %v334_v52 = vsel %vm333_vm2, %v325_v36, %v329_v35  ;;  %v335_v55 = vsel %vm333_vm2, %v326_v22, %v330_v30  ;;  %v277_v56 = vmul.f32 %v1044_v25, %v267_v50  ;;  %v230_v21 = vpop.xlane.xlu1 %229 }
  0xe7   : > { %v319_v54 = vadd.f32 %v311_v28, %v279_v44  ;;  %v338_v57 = vsel %vm333_vm2, %v329_v35, %v325_v36  ;;  %v318_v59 = vadd.f32 %v310_v43, %v278_v51  ;;  %v236_v61 = vmul.f32 0.0078125, %v226_v48  ;;  %v228_v44 = vpop.xlane.xlu0 %227 }
  0xe8   : > { %v371_v58 = vadd.f32 %v363_v45, %v320_v49  ;;  %v351_v60 = vsel %vm347_vm3, %v338_v57, 0.0  ;;  %v317_v62 = vadd.f32 %v309_v33, %v277_v56  ;;  %v360_v63 = vmul.f32 %v1047_v26, %v334_v52 }
  0xe9   : > { %v361_v8 = vmul.f32 %v1047_v26, %v351_v60  ;;  %v235_v9 = vmul.f32 0.0078125, %v224_v53  ;;  %v362_v11 = vmul.f32 %v1047_v26, %v335_v55  ;;  %v248_v13 = vrot.slane %v236_v61, 7 }
  0xea   : > { %v381_v12 = vadd.f32 %v1049_v27, %v371_v58  ;;  %v331_v15 = vrot.slane %v236_v61, 1  ;;  %v368_v18 = vadd.f32 %v360_v63, %v317_v62  ;;  %v314_v24 = vmul.f32 %v1039_v17, %v236_v61 }
  0xeb   : > { %v369_v19 = vadd.f32 %v361_v8, %v318_v59  ;;  %v244_v20 = vrot.slane %v235_v9, 7  ;;  %v370_v22 = vadd.f32 %v362_v11, %v319_v54  ;;  %v327_v28 = vrot.slane %v235_v9, 1 }
  0xec   : > { %v607_v23 = vmul.f32 -1.442695, %v381_v12  ;;  %v378_v29 = vadd.f32 %v1049_v27, %v368_v18  ;;  %v313_v32 = vmul.f32 %v1039_v17, %v235_v9  ;;  %v238_v36 = vmul.f32 0.0078125, %v230_v21 }
  0xed   : > { %v379_v30 = vadd.f32 %v1049_v27, %v369_v19  ;;  %v253_v31 = vsel %vm250_vm0, %v244_v20, %v248_v13  ;;  %v257_v33 = vsel %vm250_vm0, %v248_v13, %v244_v20  ;;  %v336_v35 = vsel %vm333_vm2, %v327_v28, %v331_v15 }
  0xee   : > { %v282_v34 = vmul.f32 %v1044_v25, %v253_v31  ;;  %686 = vpow2.f32 %v607_v23  ;;  %v604_v37 = vmul.f32 -1.442695, %v378_v29  ;;  %v271_v39 = vsel %vm261_vm1, %v257_v33, 0.0 }
  0xef   : > { %v605_v38 = vmul.f32 -1.442695, %v379_v30  ;;  %v281_v40 = vmul.f32 %v1044_v25, %v271_v39  ;;  %v340_v42 = vsel %vm333_vm2, %v331_v15, %v327_v28  ;;  %v364_v43 = vmul.f32 %v1047_v26, %v336_v35 }
  0xf0   : > { %v322_v41 = vadd.f32 %v314_v24, %v282_v34  ;;  %688 = vpow2.f32 %v604_v37  ;;  %v355_v45 = vsel %vm347_vm3, %v340_v42, 0.0  ;;  %v249_v48 = vrot.slane %v238_v36, 7 }
  0xf1   : > { %690 = vpow2.f32 %v605_v38  ;;  %v321_v46 = vadd.f32 %v313_v32, %v281_v40  ;;  %v365_v47 = vmul.f32 %v1047_v26, %v355_v45  ;;  %v332_v49 = vrot.slane %v238_v36, 1 }
  0xf2   : > { %v237_v50 = vmul.f32 0.0078125, %v228_v44  ;;  %v380_v51 = vadd.f32 %v1049_v27, %v370_v22  ;;  %v316_v57 = vmul.f32 %v1039_v17, %v238_v36 }
  0xf3   : > { %v372_v52 = vadd.f32 %v364_v43, %v321_v46  ;;  %v373_v53 = vadd.f32 %v365_v47, %v322_v41 }
  0xf4   : > { %v245_v54 = vrot.slane %v237_v50, 7  ;;  %v328_v55 = vrot.slane %v237_v50, 1  ;;  %v315_v58 = vmul.f32 %v1039_v17, %v237_v50  ;;  %v606_v63 = vmul.f32 -1.442695, %v380_v51 }
  0xf5   : > { %v383_v56 = vadd.f32 %v1049_v27, %v373_v53  ;;  %v382_v8 = vadd.f32 %v1049_v27, %v372_v52 }
  0xf6   : > { %v254_v59 = vsel %vm250_vm0, %v245_v54, %v249_v48  ;;  %v258_v60 = vsel %vm250_vm0, %v249_v48, %v245_v54  ;;  %v337_v61 = vsel %vm333_vm2, %v328_v55, %v332_v49  ;;  %v341_v62 = vsel %vm333_vm2, %v332_v49, %v328_v55 }
  0xf7   : > { %v273_v9 = vsel %vm261_vm1, %v258_v60, 0.0  ;;  %v284_v17 = vmul.f32 %v1044_v25, %v254_v59  ;;  %v609_v12 = vmul.f32 -1.442695, %v383_v56  ;;  %v357_v15 = vsel %vm347_vm3, %v341_v62, 0.0 }
  0xf8   : > { %v687_v11 = vpop.eup %686  ;;  %v283_v13 = vmul.f32 %v1044_v25, %v273_v9  ;;  %v366_v18 = vmul.f32 %v1047_v26, %v337_v61  ;;  %v367_v10 = vmul.f32 %v1047_v26, %v357_v15  ;;  %692 = vpow2.f32 %v606_v63 }
  0xf9   : > { %v324_v19 = vadd.f32 %v316_v57, %v284_v17  ;;  %v608_v23 = vmul.f32 -1.442695, %v382_v8  ;;  %694 = vpow2.f32 %v609_v12  ;;  %v413_v25 = vadd.f32 1.0, %v687_v11 }
  0xfa   : > { %v689_v20 = vpop.eup %688  ;;  %v323_v21 = vadd.f32 %v315_v58, %v283_v13 }
  0xfb   : > { %v691_v22 = vpop.eup %690  ;;  %v410_v14 = vadd.f32 1.0, %v689_v20  ;;  %v375_v29 = vadd.f32 %v367_v10, %v324_v19 }
  0xfc   : > { %v411_v24 = vadd.f32 1.0, %v691_v22  ;;  %v374_v28 = vadd.f32 %v366_v18, %v323_v21 }
  0xfd   : > { %696 = vrcp.f32 %v410_v14  ;;  %v385_v30 = vadd.f32 %v1049_v27, %v375_v29 }
  0xfe   : > { %698 = vrcp.f32 %v411_v24  ;;  %v384_v16 = vadd.f32 %v1049_v27, %v374_v28 }
  0xff   : > { %700 = vpow2.f32 %v608_v23  ;;  %v611_v26 = vmul.f32 -1.442695, %v385_v30 }
 0x100   : > { %v610_v31 = vmul.f32 -1.442695, %v384_v16  ;;  %702 = vrcp.f32 %v413_v25 }
 0x102   : > { %704 = vpow2.f32 %v610_v31  ;;  %v693_v32 = vpop.eup %692 }
 0x103   : > { %v695_v33 = vpop.eup %694  ;;  %706 = vpow2.f32 %v611_v26  ;;  %v412_v37 = vadd.f32 1.0, %v693_v32 }
 0x104   : > { %v415_v35 = vadd.f32 1.0, %v695_v33 }
 0x106   : > { %708 = vrcp.f32 %v415_v35 }
 0x107   : > { %v697_v34 = vpop.eup %696  ;;  %710 = vrcp.f32 %v412_v37 }
 0x108   : > { %v699_v36 = vpop.eup %698  ;;  %436 = vperm.xlu0 %684, %v697_v34  }
 0x109   : > { %441 = vperm.xlu1 %685, %v699_v36   ;;  %v701_v38 = vpop.eup %700 }
 0x10a   : > { %v703_v39 = vpop.eup %702  ;;  %v414_v40 = vadd.f32 1.0, %v701_v38 }
 0x10c   : > { %v705_v27 = vpop.eup %704  ;;  %712 = vrcp.f32 %v414_v40 }
 0x10d   : > { %451 = vperm.xlu1 %685, %v703_v39   ;;  %v416_v41 = vadd.f32 1.0, %v705_v27  ;;  %v707_v42 = vpop.eup %706 }
 0x10e   : > { %v417_v44 = vadd.f32 1.0, %v707_v42 }
 0x10f   : > { %714 = vrcp.f32 %v416_v41 }
 0x110   : > { %v709_v43 = vpop.eup %708  ;;  %716 = vrcp.f32 %v417_v44 }
 0x111   : > { %461 = vperm.xlu1 %685, %v709_v43   ;;  %v711_v45 = vpop.eup %710 }
 0x115   : > { %446 = vperm.xlu1 %685, %v711_v45  }
 0x116   : > { %v713_v46 = vpop.eup %712 }
 0x119   : > { %456 = vperm.xlu1 %685, %v713_v46   ;;  %v715_v47 = vpop.eup %714 }
 0x11a   : > { %v717_v48 = vpop.eup %716 }
 0x11d   : > { %466 = vperm.xlu1 %685, %v715_v47  }
 0x121   : > { %471 = vperm.xlu1 %685, %v717_v48  }
 0x187   : > { %v437_v49 = vpop.permute.xlu0 %436 }
 0x188   : > { %v442_v50 = vpop.permute.xlu1 %441  ;;  %v474_v51 = vmul.f32 %v437_v49, %v1009_v1 }
 0x189   : > { %v475_v52 = vmul.f32 %v442_v50, %v1015_v3 }
 0x18a   : > { %482 = vst [vmem:[%s204_s21] sm:$0xff] %v474_v51 }
 0x18b   : > { %483 = vst [vmem:[%s204_s21 + $0x8] sm:$0xff] %v475_v52 }
 0x18c   : > { %v452_v53 = vpop.permute.xlu1 %451 }
 0x18d   : > { %v477_v54 = vmul.f32 %v452_v53, %v1013_v2 }
 0x18f   : > { %485 = vst [vmem:[%s204_s21 + $0x18] sm:$0xff] %v477_v54 }
 0x190   : > { %v462_v55 = vpop.permute.xlu1 %461 }
 0x191   : > { %v479_v56 = vmul.f32 %v462_v55, %v1019_v4 }
 0x193   : > { %487 = vst [vmem:[%s204_s21 + $0x28] sm:$0xff] %v479_v56 }
 0x194   : > { %v447_v57 = vpop.permute.xlu1 %446 }
 0x195   : > { %v476_v58 = vmul.f32 %v447_v57, %v1007_v0 }
 0x197   : > { %484 = vst [vmem:[%s204_s21 + $0x10] sm:$0xff] %v476_v58 }
 0x198   : > { %v457_v1 = vpop.permute.xlu1 %456 }
 0x199   : > { %v478_v3 = vmul.f32 %v457_v1, %v1021_v5 }
 0x19b   : > { %486 = vst [vmem:[%s204_s21 + $0x20] sm:$0xff] %v478_v3 }
 0x19c   : > { %v467_v59 = vpop.permute.xlu1 %466 }
 0x19d   : > { %v480_v60 = vmul.f32 %v467_v59, %v1027_v7 }
 0x19f   : > { %488 = vst [vmem:[%s204_s21 + $0x30] sm:$0xff] %v480_v60 }
 0x1a0   : > { %v472_v2 = vpop.permute.xlu1 %471 }
 0x1a1   : > { %v481_v0 = vmul.f32 %v472_v2, %v1025_v6 }
 0x1a3   : > { %489 = vst [vmem:[%s204_s21 + $0x38] sm:$0xff] %v481_v0 }
 0x1a4   : > { %776 = shalt.err (!%p773_p11)
}
 0x1a5   : > { %s777_s13 = scalar_lea.hbm %s1144_s5, 1024  ;;  %s781_s6 = scalar_lea.hbm %s1194_s3, 2048 }
 0x1a6   : > { %p778_p0 = scmp.ne.s32.totalorder %s1144_s5, %s777_s13  ;;  %p782_p5 = scmp.lt.u32.totalorder %s1144_s5, %s1194_s3 }
 0x1a7   : > { %p783_p12 = scmp.lt.u32.totalorder %s781_s6, %s777_s13  ;;  %p785_p13 = scmp.lt.u32.totalorder %s777_s13, %s1144_s5 }
 0x1a8   : > { %p779_p2 = pnand %p778_p0, %p1208_p3 }
 0x1a9   : > { %p784_p6 = por %p783_p12, %p782_p5 }
 0x1aa   : > { %p780_p7 = pneg %p779_p2 }
 0x1ab   : > { %p786_p8 = por %p785_p13, %p784_p6 }
 0x1ad   : > { %p787_p9 = pnand %p786_p8, %p780_p7 }
 0x1af   : > { %790 = shalt.err (!%p787_p9)
}
 0x1b0   : > { %s841_s12 = smov 128   ;;  %s842_s20 = smov 8  }
 0x1b1   : > { %628 = dma.vmem_to_hbm [thread:$0]  (%p1208_p3), %s1146_s30, 1024, %s1144_s5, %s491_s8, %s841_s12, %s841_s12, %s842_s20  }
 0x1b2 PF: > { %s520_s21 = sand.u32 1, %s821_s14   ;;  %p1209_p10 = scmp.ne.s32.totalorder %s1201_s26, 0 }
 0x1b3   : > { %p1210_p1 = scmp.ge.s32.totalorder %s833_s17, 2  ;;  %s521_s29 = scalar_lea.sflag [#allocation5], %s520_s21 }
 0x1b5   : > { %p639_p4 = pnand %p1210_p1, %p1209_p10 }
 0x1b7   : > { %816 = dma.done.wait (!%p639_p4), %s521_s29, 1024  }
 0x1b8   : > { %818 = vsyncadd (!%p639_p4), %s521_s29, 4294966272  ;;  %p18_p11 = scmp.ge.s32.totalorder %s891_s19, 4   ;;  %s1211_s14 = smov %s825_s15 }
 0x1b9   : > { %s1212_s15 = smov %s829_s16  ;;  %s1213_s16 = smov %s903_s22 }
 0x1ba   : > { %s1214_s17 = smov %s891_s19  ;;  %20 = sbr.rel (!%p18_p11) target bundleno = 8 (0x8), region = 82 }
 0x1c1   :  { %526 = vsyncpa [#allocation4], 1 }
 0x1c2   :  { %528 = vsyncpa [#allocation4 + $0x1], 1 }
 0x1c3   :  { %529 = vsyncpa [#allocation5], 1 }
 0x1c4   :  { %531 = vsyncpa [#allocation5 + $0x1], 1 }
 0x1c5   :  { %532 = vsyncpa [#allocation6], 1 }
 0x1c6   :  { %534 = vsyncpa [#allocation6 + $0x1], 1 }

</bundles_post_ra>
